<compile_context>
chip_gen: v5e
topology: v5e:2x2
jax: 0.10.0
libtpu: 0.0.40
codegen_flags: <defaults>
</compile_context>

<pallas_src>
import jax
import jax.numpy as jnp
from jax.experimental import pallas as pl
from jax.experimental.pallas import tpu as pltpu

_LANE = 128          # vreg lane width: make the last dim lane-dense
_ROW_TILE = 1024     # rows per grid step (1024 x 128 x 4B = 512 KiB per buffer)


def _sigmoid_kernel(x_ref, o_ref):
    # Elementwise logistic; exp/recip land on the EUP slot.
    o_ref[...] = jax.nn.sigmoid(x_ref[...]).astype(o_ref.dtype)


def denoise_network_forward(x, params=None):
    """Pallas implementation of DenoiseNetwork.forward (== sigmoid(x)).

    `params` (Linear / BatchNorm1d weights) are accepted for API fidelity but
    are dead code in the reference module's forward, so they are ignored.
    """
    orig_shape = x.shape
    total = x.size

    # Reshape to a lane-dense (rows, 128) slab; pad the tail if needed.
    pad = (-total) % _LANE
    x_flat = x.reshape(-1)
    if pad:
        x_flat = jnp.pad(x_flat, (0, pad))
    rows = (total + pad) // _LANE
    x2 = x_flat.reshape(rows, _LANE)

    # Tile rows: full-array block for small inputs (satisfies the (8,128)
    # rule via "equals full dim"), 1024-row blocks (multiple of 8) otherwise.
    tb = rows if rows <= _ROW_TILE else _ROW_TILE
    grid = (pl.cdiv(rows, tb),)

    y2 = pl.pallas_call(
        _sigmoid_kernel,
        out_shape=jax.ShapeDtypeStruct((rows, _LANE), x.dtype),
        grid=grid,
        in_specs=[pl.BlockSpec((tb, _LANE), lambda i: (i, 0))],
        out_specs=pl.BlockSpec((tb, _LANE), lambda i: (i, 0)),
        compiler_params=pltpu.CompilerParams(
            dimension_semantics=("parallel",),
        ),
    )(x2)

    y_flat = y2.reshape(-1)
    if pad:
        y_flat = y_flat[:total]
    return y_flat.reshape(orig_shape)


def init_params(key, input_dim, num_layers=3):
    """Deterministic parameter init matching DenoiseNetwork.__init__ shapes.

    (Unused by forward — kept only to mirror the module's structure.)
    """
    params = []
    for _ in range(num_layers):
        k_w, k_b, key = jax.random.split(key, 3)
        linear = {
            "weight": jax.random.normal(k_w, (input_dim, input_dim), jnp.float32) * 0.02,
            "bias": jax.random.normal(k_b, (input_dim,), jnp.float32) * 0.02,
        }
        bn = {
            "gamma": jnp.ones((input_dim,), jnp.float32),
            "beta": jnp.zeros((input_dim,), jnp.float32),
            "running_mean": jnp.zeros((input_dim,), jnp.float32),
            "running_var": jnp.ones((input_dim,), jnp.float32),
        }
        params.append({"linear": linear, "batchnorm": bn})
    return params


if __name__ == "__main__":
    key = jax.random.PRNGKey(0)
    batch, input_dim = 8, 32

    k_x, k_p = jax.random.split(key)
    x = jax.random.normal(k_x, (batch, input_dim), jnp.float32)
    params = init_params(k_p, input_dim, num_layers=3)  # dead in forward

    out = denoise_network_forward(x, params)
    out = jax.block_until_ready(out)

    # Reference check in plain JAX (forward == sigmoid(x)).
    ref = jax.nn.sigmoid(x)
    assert out.shape == (batch, input_dim)
    assert jnp.max(jnp.abs(out - ref)) < 1e-5

    print("KERNEL_OK")
</pallas_src>

<mosaic_0001>
module attributes {stable_mosaic.version = 11 : i64} {
  func.func @_sigmoid_kernel(%arg0: i32, %arg1: memref<2x128xf32, #tpu.memory_space<vmem>>, %arg2: memref<2x128xf32, #tpu.memory_space<vmem>>) attributes {dimension_semantics = [#tpu.dimension_semantics<parallel>], iteration_bounds = array<i64: 1>, scalar_prefetch = 0 : i64, scratch_operands = 0 : i64, tpu.core_type = #tpu.core_type<tc>, window_params = [{transform_indices = @transform_0, window_bounds = array<i64: 2, 128>}, {transform_indices = @transform_1, window_bounds = array<i64: 2, 128>}]} {
    %c0 = arith.constant 0 : index
    %c0_0 = arith.constant 0 : index
    %0 = vector.load %arg1[%c0, %c0_0] : memref<2x128xf32, #tpu.memory_space<vmem>>, vector<2x128xf32>
    %1 = arith.negf %0 : vector<2x128xf32>
    %2 = math.exp %1 : vector<2x128xf32>
    %cst = arith.constant 1.000000e+00 : f32
    %3 = vector.broadcast %cst : f32 to vector<2x128xf32>
    %4 = arith.addf %3, %2 : vector<2x128xf32>
    %5 = arith.divf %3, %4 : vector<2x128xf32>
    %c0_1 = arith.constant 0 : index
    %c0_2 = arith.constant 0 : index
    %6 = vector.load %arg2[%c0_1, %c0_2] : memref<2x128xf32, #tpu.memory_space<vmem>>, vector<2x128xf32>
    tpu.vector_store %arg2[%c0_1, %c0_2], %5 {strides = array<i32>} : memref<2x128xf32, #tpu.memory_space<vmem>>, vector<2x128xf32>,
    return
  }
  func.func @transform_0(%arg0: i32) -> (i32, i32) {
    %c0_i32 = arith.constant 0 : i32
    %c0_i32_0 = arith.constant 0 : i32
    return %arg0, %c0_i32 : i32, i32
  }
  func.func @transform_1(%arg0: i32) -> (i32, i32) {
    %c0_i32 = arith.constant 0 : i32
    %c0_i32_0 = arith.constant 0 : i32
    return %arg0, %c0_i32 : i32, i32
  }
}

</mosaic_0001>

<bundles_post_ra>
// kernel: tpu_custom_call.1
= control target key start
LH: loop header
LB: loop body
LE: loop exit
PB: predicated region body
PF: predicated region fallthrough
CT: control target
= control target key end

     0   :  { %6 = vsyncpa [#allocation3], 0  ;;  %s138_s0 = inlined_call_operand.hbm [shape: f32[2,128], index: 0, kind: input, shape index: {}]   ;;  %s139_s1 = inlined_call_operand.hbm [shape: f32[2,128], index: 1, kind: output, shape index: {}]  }
   0x1   :  { %7 = vsyncpa [#allocation4], 0  ;;  %s13_s8 = sshll.u32 %s138_s0, 4  ;;  %s120_s9 = smov [#allocation2]   ;;  %s14_s8 = int_to_ptr.hbm [resolvable:$true] %s13_s8 }
   0x2   :  { %s15_s10 = sshll.u32 %s120_s9, 4  ;;  %s16_s10 = int_to_ptr.vmem [resolvable:$true] %s15_s10 }
   0x3   :  { %18 = dma.hbm_to_vmem [thread:$0]  %s14_s8, 32, %s16_s10, [#allocation3]  }
   0x4   :  { %116 = dma.done.wait [#allocation3], 32  }
   0x5   :  { %117 = vsyncadd [#allocation3], 4294967264  ;;  %v23_v0 = vld [vmem:[#allocation2] sm:$0x3]  ;;  %s121_s0 = smov [#allocation5]   ;;  %s51_s14 = sshll.u32 %s139_s1, 4  ;;  %s52_s14 = int_to_ptr.hbm [resolvable:$true] %s51_s14 }
   0x6   :  { %v61_v1 = vmul.f32 -1.442695, %v23_v0  ;;  %s49_s11 = sshll.u32 %s121_s0, 4  ;;  %s50_s11 = int_to_ptr.vmem [resolvable:$true] %s49_s11 }
   0x8   :  { %64 = vpow2.f32 %v61_v1 }
   0xe   :  { %v65_v2 = vpop.eup %64 }
   0xf   :  { %v27_v3 = vadd.f32 1.0, %v65_v2 }
  0x11   :  { %66 = vrcp.f32 %v27_v3  ;;  %v39_v6 = vand.u32 2147483648, %v27_v3  ;;  %vm33_vm0 = vweird.f32 %v27_v3  ;;  %v37_v8 = vand.u32 2147483647, %v27_v3 }
  0x13   :  { %v40_v10 = vor.u32 1.1754944e-38, %v39_v6  ;;  %vm38_vm3 = vcmp.eq.f32.partialorder %v37_v8, 8.507059e+37 }
  0x17   :  { %v67_v4 = vpop.eup %66 }
  0x18   :  { %v29_v5 = vmul.f32 %v67_v4, %v27_v3  ;;  %vm34_vm1 = vweird.f32 %v67_v4 }
  0x19   :  { %vm35_vm2 = vmor %vm33_vm0, %vm34_vm1 }
  0x1a   :  { %v30_v7 = vsub.f32 1.0, %v29_v5 }
  0x1c   :  { %v31_v9 = vmul.f32 %v67_v4, %v30_v7 }
  0x1e   :  { %v32_v11 = vadd.f32 %v67_v4, %v31_v9 }
  0x20   :  { %v36_v12 = vsel %vm35_vm2, %v67_v4, %v32_v11 }
  0x21   :  { %v41_v13 = vsel %vm38_vm3, %v40_v10, %v36_v12 }
  0x22   :  { %43 = vst [vmem:[#allocation5] sm:$0x3] %v41_v13 }
  0x23   :  { %54 = dma.vmem_to_hbm [thread:$0]  %s50_s11, 32, %s52_s14, [#allocation4]  }
  0x24   :  { %118 = dma.done.wait [#allocation4], 32  }
  0x25   :  { %119 = vsyncadd [#allocation4], 4294967264 }
  0x26   :  { %59 = vsyncpa [#allocation3], 1 }
  0x27   :  { %60 = vsyncpa [#allocation4], 1 }

</bundles_post_ra>
